<compile_context>
chip_gen: v7x
topology: tpu7x:2x2x1
jax: 0.10.0
libtpu: 0.0.40
codegen_flags: <defaults>
</compile_context>

<pallas_src>
import jax
import jax.numpy as jnp
from jax import lax
from jax.experimental import pallas as pl
from jax.experimental.pallas import tpu as pltpu


def nnlm_kernel(ids_ref,            # SMEM (B, W) int32 token ids (scalar prefetch)
                tab_ref,            # VMEM (V, E) f32 embedding table (resident)
                wh_ref,             # VMEM (W*E, H) bf16 stacked hidden weight (resident)
                bh_ref,             # VMEM (1, H) f32 hidden bias (resident)
                wo_ref,             # VMEM (H, V) bf16 output weight (resident)
                bo_ref,             # VMEM (1, V) f32 output bias (resident)
                out_ref,            # VMEM (TB, V) f32 log-probs for this batch tile
                xcat_ref):          # VMEM scratch (TB, W*E) f32 concatenated embeddings
    tile_b, cat = xcat_ref.shape
    emb_dim = tab_ref.shape[1]
    window = cat // emb_dim
    row0 = pl.program_id(0) * tile_b

    # In-kernel gather: copy the W embedding rows of each example into the
    # concatenated layout.  Token ids come from SMEM (scalar prefetch), table
    # rows are dynamic sublane slices of the VMEM-resident table.
    def gather_row(b, carry):
        for w in range(window):                      # W is a small static constant
            tok = ids_ref[row0 + b, w]
            xcat_ref[pl.ds(b, 1), pl.ds(w * emb_dim, emb_dim)] = tab_ref[pl.ds(tok, 1), :]
        return carry

    lax.fori_loop(0, tile_b, gather_row, 0, unroll=True)

    # Window-sum folded into the MXU: concat(emb) @ stack(Wh) == sum(emb) @ Wh.
    xcat = xcat_ref[...].astype(jnp.bfloat16)
    h = jnp.tanh(
        jnp.dot(xcat, wh_ref[...], preferred_element_type=jnp.float32) + bh_ref[...]
    )                                                                   # (TB, H) f32
    logits = (
        jnp.dot(h.astype(jnp.bfloat16), wo_ref[...],
                preferred_element_type=jnp.float32) + bo_ref[...]
    )                                                                   # (TB, V) f32

    # Numerically-stable log_softmax over the vocab axis (f32 elementwise).
    m = jnp.max(logits, axis=-1, keepdims=True)
    shifted = logits - m
    lse = jnp.log(jnp.sum(jnp.exp(shifted), axis=-1, keepdims=True))
    out_ref[...] = (shifted - lse).astype(out_ref.dtype)


def nnlm_forward(token_ids, emb_table, w_hidden, b_hidden, w_out, b_out, *, tile_b=8):
    """token_ids: (B, W) int32. Returns (B, V) float32 log-probabilities."""
    B, W = token_ids.shape
    V, E = emb_table.shape
    H = w_hidden.shape[0]
    assert B % tile_b == 0, "demo wrapper requires B % tile_b == 0"
    num_tiles = B // tile_b

    # Weight prep (one-time, outside the kernel):
    #  - hidden weight transposed and stacked W times along K (window-sum fold),
    #  - big MXU operands cast to bf16 (f32 accumulation inside the kernel),
    #  - biases kept f32 for the VPU adds.
    wh_stack = jnp.tile(w_hidden.T, (W, 1)).astype(jnp.bfloat16)   # (W*E, H)
    wo_t = w_out.T.astype(jnp.bfloat16)                            # (H, V)
    bh = b_hidden.reshape(1, H).astype(jnp.float32)
    bo = b_out.reshape(1, V).astype(jnp.float32)
    tab = emb_table.astype(jnp.float32)                            # kept f32: dynamic
                                                                   # row slices stay 32-bit

    grid_spec = pltpu.PrefetchScalarGridSpec(
        num_scalar_prefetch=1,                      # token_ids -> SMEM
        grid=(num_tiles,),                          # batch tiles
        in_specs=[
            pl.BlockSpec((V, E), lambda i, ids: (0, 0)),        # emb table, resident
            pl.BlockSpec((W * E, H), lambda i, ids: (0, 0)),    # stacked hidden weight
            pl.BlockSpec((1, H), lambda i, ids: (0, 0)),        # hidden bias
            pl.BlockSpec((H, V), lambda i, ids: (0, 0)),        # output weight
            pl.BlockSpec((1, V), lambda i, ids: (0, 0)),        # output bias
        ],
        out_specs=pl.BlockSpec((tile_b, V), lambda i, ids: (i, 0)),
        scratch_shapes=[pltpu.VMEM((tile_b, W * E), jnp.float32)],
    )

    return pl.pallas_call(
        nnlm_kernel,
        out_shape=jax.ShapeDtypeStruct((B, V), jnp.float32),
        grid_spec=grid_spec,
        compiler_params=pltpu.CompilerParams(
            dimension_semantics=("parallel",),      # batch axis -> both TCs on v7x
        ),
    )(token_ids.astype(jnp.int32), tab, wh_stack, bh, wo_t, bo)


if __name__ == "__main__":
    # Small, module-consistent shapes (lane-friendly H / V, batch tiled by 8).
    embedding_size = 64
    hidden_size = 128
    vocab_size = 256
    window_size = 3
    batch = 16

    key = jax.random.PRNGKey(0)
    k_emb, k_wh, k_bh, k_wo, k_bo, k_idx = jax.random.split(key, 6)

    emb_table = jax.random.normal(k_emb, (vocab_size, embedding_size), jnp.float32) * 0.1
    w_hidden = jax.random.normal(k_wh, (hidden_size, embedding_size), jnp.float32) * 0.1
    b_hidden = jax.random.normal(k_bh, (hidden_size,), jnp.float32) * 0.1
    w_out = jax.random.normal(k_wo, (vocab_size, hidden_size), jnp.float32) * 0.1
    b_out = jax.random.normal(k_bo, (vocab_size,), jnp.float32) * 0.1
    token_ids = jax.random.randint(k_idx, (batch, window_size), 0, vocab_size, jnp.int32)

    log_probs = jax.block_until_ready(
        nnlm_forward(token_ids, emb_table, w_hidden, b_hidden, w_out, b_out, tile_b=8)
    )
    assert log_probs.shape == (batch, vocab_size)

    # Reference 1: exact f32 module semantics (kernel uses bf16 MXU inputs -> loose tol).
    x_f32 = jnp.sum(emb_table[token_ids], axis=1)
    h_f32 = jnp.tanh(x_f32 @ w_hidden.T + b_hidden)
    ref_f32 = jax.nn.log_softmax(h_f32 @ w_out.T + b_out, axis=-1)

    # Reference 2: mirrors the kernel's quantization points (tight tol).
    xcat = emb_table[token_ids].reshape(batch, window_size * embedding_size)
    wh_stack = jnp.tile(w_hidden.T, (window_size, 1)).astype(jnp.bfloat16)
    h_m = jnp.tanh(
        jnp.dot(xcat.astype(jnp.bfloat16), wh_stack, preferred_element_type=jnp.float32)
        + b_hidden
    )
    logits_m = jnp.dot(
        h_m.astype(jnp.bfloat16), w_out.T.astype(jnp.bfloat16),
        preferred_element_type=jnp.float32,
    ) + b_out
    ref_bf16 = jax.nn.log_softmax(logits_m, axis=-1)

    assert jnp.allclose(log_probs, ref_bf16, atol=5e-3, rtol=5e-3)
    assert jnp.allclose(log_probs, ref_f32, atol=5e-2, rtol=5e-2)

    print("KERNEL_OK")
</pallas_src>

<mosaic_0001>
module attributes {stable_mosaic.version = 11 : i64} {
  func.func @nnlm_kernel(%arg0: i32, %arg1: memref<16x3xi32, #tpu.memory_space<smem>>, %arg2: memref<256x64xf32, #tpu.memory_space<vmem>>, %arg3: memref<192x128xbf16, #tpu.memory_space<vmem>>, %arg4: memref<1x128xf32, #tpu.memory_space<vmem>>, %arg5: memref<128x256xbf16, #tpu.memory_space<vmem>>, %arg6: memref<1x256xf32, #tpu.memory_space<vmem>>, %arg7: memref<8x256xf32, #tpu.memory_space<vmem>>, %arg8: memref<8x192xf32, #tpu.memory_space<vmem>>) attributes {dimension_semantics = [#tpu.dimension_semantics<parallel>], iteration_bounds = array<i64: 2>, scalar_prefetch = 1 : i64, scratch_operands = 1 : i64, tpu.core_type = #tpu.core_type<tc>, window_params = [{pipeline_mode = #tpu.pipeline_mode<synchronous>, transform_indices = @transform_0, window_bounds = array<i64: 256, 64>}, {pipeline_mode = #tpu.pipeline_mode<synchronous>, transform_indices = @transform_1, window_bounds = array<i64: 192, 128>}, {pipeline_mode = #tpu.pipeline_mode<synchronous>, transform_indices = @transform_2, window_bounds = array<i64: 1, 128>}, {pipeline_mode = #tpu.pipeline_mode<synchronous>, transform_indices = @transform_3, window_bounds = array<i64: 128, 256>}, {pipeline_mode = #tpu.pipeline_mode<synchronous>, transform_indices = @transform_4, window_bounds = array<i64: 1, 256>}, {transform_indices = @transform_5, window_bounds = array<i64: 8, 256>}]} {
    %c8_i32 = arith.constant 8 : i32
    %0 = arith.muli %arg0, %c8_i32 : i32
    %c0_i32 = arith.constant 0 : i32
    %1 = arith.addi %0, %c0_i32 : i32
    %2 = arith.index_cast %1 : i32 to index
    %c0 = arith.constant 0 : index
    %3 = memref.load %arg1[%2, %c0] : memref<16x3xi32, #tpu.memory_space<smem>>
    %4 = arith.index_cast %3 : i32 to index
    %c0_0 = arith.constant 0 : index
    %5 = vector.load %arg2[%4, %c0_0] : memref<256x64xf32, #tpu.memory_space<vmem>>, vector<1x64xf32>
    %6 = arith.index_cast %c0_i32 : i32 to index
    %c0_1 = arith.constant 0 : index
    %7 = vector.load %arg8[%6, %c0_1] : memref<8x192xf32, #tpu.memory_space<vmem>>, vector<1x64xf32>
    tpu.vector_store %arg8[%6, %c0_1], %5 {strides = array<i32>} : memref<8x192xf32, #tpu.memory_space<vmem>>, vector<1x64xf32>,
    %8 = arith.addi %0, %c0_i32 : i32
    %9 = arith.index_cast %8 : i32 to index
    %c1 = arith.constant 1 : index
    %10 = memref.load %arg1[%9, %c1] : memref<16x3xi32, #tpu.memory_space<smem>>
    %11 = arith.index_cast %10 : i32 to index
    %c0_2 = arith.constant 0 : index
    %12 = vector.load %arg2[%11, %c0_2] : memref<256x64xf32, #tpu.memory_space<vmem>>, vector<1x64xf32>
    %13 = arith.index_cast %c0_i32 : i32 to index
    %c64 = arith.constant 64 : index
    %14 = vector.load %arg8[%13, %c64] : memref<8x192xf32, #tpu.memory_space<vmem>>, vector<1x64xf32>
    tpu.vector_store %arg8[%13, %c64], %12 {strides = array<i32>} : memref<8x192xf32, #tpu.memory_space<vmem>>, vector<1x64xf32>,
    %15 = arith.addi %0, %c0_i32 : i32
    %16 = arith.index_cast %15 : i32 to index
    %c2 = arith.constant 2 : index
    %17 = memref.load %arg1[%16, %c2] : memref<16x3xi32, #tpu.memory_space<smem>>
    %18 = arith.index_cast %17 : i32 to index
    %c0_3 = arith.constant 0 : index
    %19 = vector.load %arg2[%18, %c0_3] : memref<256x64xf32, #tpu.memory_space<vmem>>, vector<1x64xf32>
    %20 = arith.index_cast %c0_i32 : i32 to index
    %c128 = arith.constant 128 : index
    %21 = vector.load %arg8[%20, %c128] : memref<8x192xf32, #tpu.memory_space<vmem>>, vector<1x64xf32>
    tpu.vector_store %arg8[%20, %c128], %19 {strides = array<i32>} : memref<8x192xf32, #tpu.memory_space<vmem>>, vector<1x64xf32>,
    %c1_i32 = arith.constant 1 : i32
    %22 = arith.addi %0, %c1_i32 : i32
    %23 = arith.index_cast %22 : i32 to index
    %c0_4 = arith.constant 0 : index
    %24 = memref.load %arg1[%23, %c0_4] : memref<16x3xi32, #tpu.memory_space<smem>>
    %25 = arith.index_cast %24 : i32 to index
    %c0_5 = arith.constant 0 : index
    %26 = vector.load %arg2[%25, %c0_5] : memref<256x64xf32, #tpu.memory_space<vmem>>, vector<1x64xf32>
    %27 = arith.index_cast %c1_i32 : i32 to index
    %c0_6 = arith.constant 0 : index
    %28 = vector.load %arg8[%27, %c0_6] : memref<8x192xf32, #tpu.memory_space<vmem>>, vector<1x64xf32>
    tpu.vector_store %arg8[%27, %c0_6], %26 {strides = array<i32>} : memref<8x192xf32, #tpu.memory_space<vmem>>, vector<1x64xf32>,
    %29 = arith.addi %0, %c1_i32 : i32
    %30 = arith.index_cast %29 : i32 to index
    %c1_7 = arith.constant 1 : index
    %31 = memref.load %arg1[%30, %c1_7] : memref<16x3xi32, #tpu.memory_space<smem>>
    %32 = arith.index_cast %31 : i32 to index
    %c0_8 = arith.constant 0 : index
    %33 = vector.load %arg2[%32, %c0_8] : memref<256x64xf32, #tpu.memory_space<vmem>>, vector<1x64xf32>
    %34 = arith.index_cast %c1_i32 : i32 to index
    %c64_9 = arith.constant 64 : index
    %35 = vector.load %arg8[%34, %c64_9] : memref<8x192xf32, #tpu.memory_space<vmem>>, vector<1x64xf32>
    tpu.vector_store %arg8[%34, %c64_9], %33 {strides = array<i32>} : memref<8x192xf32, #tpu.memory_space<vmem>>, vector<1x64xf32>,
    %36 = arith.addi %0, %c1_i32 : i32
    %37 = arith.index_cast %36 : i32 to index
    %c2_10 = arith.constant 2 : index
    %38 = memref.load %arg1[%37, %c2_10] : memref<16x3xi32, #tpu.memory_space<smem>>
    %39 = arith.index_cast %38 : i32 to index
    %c0_11 = arith.constant 0 : index
    %40 = vector.load %arg2[%39, %c0_11] : memref<256x64xf32, #tpu.memory_space<vmem>>, vector<1x64xf32>
    %41 = arith.index_cast %c1_i32 : i32 to index
    %c128_12 = arith.constant 128 : index
    %42 = vector.load %arg8[%41, %c128_12] : memref<8x192xf32, #tpu.memory_space<vmem>>, vector<1x64xf32>
    tpu.vector_store %arg8[%41, %c128_12], %40 {strides = array<i32>} : memref<8x192xf32, #tpu.memory_space<vmem>>, vector<1x64xf32>,
    %c2_i32 = arith.constant 2 : i32
    %43 = arith.addi %0, %c2_i32 : i32
    %44 = arith.index_cast %43 : i32 to index
    %c0_13 = arith.constant 0 : index
    %45 = memref.load %arg1[%44, %c0_13] : memref<16x3xi32, #tpu.memory_space<smem>>
    %46 = arith.index_cast %45 : i32 to index
    %c0_14 = arith.constant 0 : index
    %47 = vector.load %arg2[%46, %c0_14] : memref<256x64xf32, #tpu.memory_space<vmem>>, vector<1x64xf32>
    %48 = arith.index_cast %c2_i32 : i32 to index
    %c0_15 = arith.constant 0 : index
    %49 = vector.load %arg8[%48, %c0_15] : memref<8x192xf32, #tpu.memory_space<vmem>>, vector<1x64xf32>
    tpu.vector_store %arg8[%48, %c0_15], %47 {strides = array<i32>} : memref<8x192xf32, #tpu.memory_space<vmem>>, vector<1x64xf32>,
    %50 = arith.addi %0, %c2_i32 : i32
    %51 = arith.index_cast %50 : i32 to index
    %c1_16 = arith.constant 1 : index
    %52 = memref.load %arg1[%51, %c1_16] : memref<16x3xi32, #tpu.memory_space<smem>>
    %53 = arith.index_cast %52 : i32 to index
    %c0_17 = arith.constant 0 : index
    %54 = vector.load %arg2[%53, %c0_17] : memref<256x64xf32, #tpu.memory_space<vmem>>, vector<1x64xf32>
    %55 = arith.index_cast %c2_i32 : i32 to index
    %c64_18 = arith.constant 64 : index
    %56 = vector.load %arg8[%55, %c64_18] : memref<8x192xf32, #tpu.memory_space<vmem>>, vector<1x64xf32>
    tpu.vector_store %arg8[%55, %c64_18], %54 {strides = array<i32>} : memref<8x192xf32, #tpu.memory_space<vmem>>, vector<1x64xf32>,
    %57 = arith.addi %0, %c2_i32 : i32
    %58 = arith.index_cast %57 : i32 to index
    %c2_19 = arith.constant 2 : index
    %59 = memref.load %arg1[%58, %c2_19] : memref<16x3xi32, #tpu.memory_space<smem>>
    %60 = arith.index_cast %59 : i32 to index
    %c0_20 = arith.constant 0 : index
    %61 = vector.load %arg2[%60, %c0_20] : memref<256x64xf32, #tpu.memory_space<vmem>>, vector<1x64xf32>
    %62 = arith.index_cast %c2_i32 : i32 to index
    %c128_21 = arith.constant 128 : index
    %63 = vector.load %arg8[%62, %c128_21] : memref<8x192xf32, #tpu.memory_space<vmem>>, vector<1x64xf32>
    tpu.vector_store %arg8[%62, %c128_21], %61 {strides = array<i32>} : memref<8x192xf32, #tpu.memory_space<vmem>>, vector<1x64xf32>,
    %c3_i32 = arith.constant 3 : i32
    %64 = arith.addi %0, %c3_i32 : i32
    %65 = arith.index_cast %64 : i32 to index
    %c0_22 = arith.constant 0 : index
    %66 = memref.load %arg1[%65, %c0_22] : memref<16x3xi32, #tpu.memory_space<smem>>
    %67 = arith.index_cast %66 : i32 to index
    %c0_23 = arith.constant 0 : index
    %68 = vector.load %arg2[%67, %c0_23] : memref<256x64xf32, #tpu.memory_space<vmem>>, vector<1x64xf32>
    %69 = arith.index_cast %c3_i32 : i32 to index
    %c0_24 = arith.constant 0 : index
    %70 = vector.load %arg8[%69, %c0_24] : memref<8x192xf32, #tpu.memory_space<vmem>>, vector<1x64xf32>
    tpu.vector_store %arg8[%69, %c0_24], %68 {strides = array<i32>} : memref<8x192xf32, #tpu.memory_space<vmem>>, vector<1x64xf32>,
    %71 = arith.addi %0, %c3_i32 : i32
    %72 = arith.index_cast %71 : i32 to index
    %c1_25 = arith.constant 1 : index
    %73 = memref.load %arg1[%72, %c1_25] : memref<16x3xi32, #tpu.memory_space<smem>>
    %74 = arith.index_cast %73 : i32 to index
    %c0_26 = arith.constant 0 : index
    %75 = vector.load %arg2[%74, %c0_26] : memref<256x64xf32, #tpu.memory_space<vmem>>, vector<1x64xf32>
    %76 = arith.index_cast %c3_i32 : i32 to index
    %c64_27 = arith.constant 64 : index
    %77 = vector.load %arg8[%76, %c64_27] : memref<8x192xf32, #tpu.memory_space<vmem>>, vector<1x64xf32>
    tpu.vector_store %arg8[%76, %c64_27], %75 {strides = array<i32>} : memref<8x192xf32, #tpu.memory_space<vmem>>, vector<1x64xf32>,
    %78 = arith.addi %0, %c3_i32 : i32
    %79 = arith.index_cast %78 : i32 to index
    %c2_28 = arith.constant 2 : index
    %80 = memref.load %arg1[%79, %c2_28] : memref<16x3xi32, #tpu.memory_space<smem>>
    %81 = arith.index_cast %80 : i32 to index
    %c0_29 = arith.constant 0 : index
    %82 = vector.load %arg2[%81, %c0_29] : memref<256x64xf32, #tpu.memory_space<vmem>>, vector<1x64xf32>
    %83 = arith.index_cast %c3_i32 : i32 to index
    %c128_30 = arith.constant 128 : index
    %84 = vector.load %arg8[%83, %c128_30] : memref<8x192xf32, #tpu.memory_space<vmem>>, vector<1x64xf32>
    tpu.vector_store %arg8[%83, %c128_30], %82 {strides = array<i32>} : memref<8x192xf32, #tpu.memory_space<vmem>>, vector<1x64xf32>,
    %c4_i32 = arith.constant 4 : i32
    %85 = arith.addi %0, %c4_i32 : i32
    %86 = arith.index_cast %85 : i32 to index
    %c0_31 = arith.constant 0 : index
    %87 = memref.load %arg1[%86, %c0_31] : memref<16x3xi32, #tpu.memory_space<smem>>
    %88 = arith.index_cast %87 : i32 to index
    %c0_32 = arith.constant 0 : index
    %89 = vector.load %arg2[%88, %c0_32] : memref<256x64xf32, #tpu.memory_space<vmem>>, vector<1x64xf32>
    %90 = arith.index_cast %c4_i32 : i32 to index
    %c0_33 = arith.constant 0 : index
    %91 = vector.load %arg8[%90, %c0_33] : memref<8x192xf32, #tpu.memory_space<vmem>>, vector<1x64xf32>
    tpu.vector_store %arg8[%90, %c0_33], %89 {strides = array<i32>} : memref<8x192xf32, #tpu.memory_space<vmem>>, vector<1x64xf32>,
    %92 = arith.addi %0, %c4_i32 : i32
    %93 = arith.index_cast %92 : i32 to index
    %c1_34 = arith.constant 1 : index
    %94 = memref.load %arg1[%93, %c1_34] : memref<16x3xi32, #tpu.memory_space<smem>>
    %95 = arith.index_cast %94 : i32 to index
    %c0_35 = arith.constant 0 : index
    %96 = vector.load %arg2[%95, %c0_35] : memref<256x64xf32, #tpu.memory_space<vmem>>, vector<1x64xf32>
    %97 = arith.index_cast %c4_i32 : i32 to index
    %c64_36 = arith.constant 64 : index
    %98 = vector.load %arg8[%97, %c64_36] : memref<8x192xf32, #tpu.memory_space<vmem>>, vector<1x64xf32>
    tpu.vector_store %arg8[%97, %c64_36], %96 {strides = array<i32>} : memref<8x192xf32, #tpu.memory_space<vmem>>, vector<1x64xf32>,
    %99 = arith.addi %0, %c4_i32 : i32
    %100 = arith.index_cast %99 : i32 to index
    %c2_37 = arith.constant 2 : index
    %101 = memref.load %arg1[%100, %c2_37] : memref<16x3xi32, #tpu.memory_space<smem>>
    %102 = arith.index_cast %101 : i32 to index
    %c0_38 = arith.constant 0 : index
    %103 = vector.load %arg2[%102, %c0_38] : memref<256x64xf32, #tpu.memory_space<vmem>>, vector<1x64xf32>
    %104 = arith.index_cast %c4_i32 : i32 to index
    %c128_39 = arith.constant 128 : index
    %105 = vector.load %arg8[%104, %c128_39] : memref<8x192xf32, #tpu.memory_space<vmem>>, vector<1x64xf32>
    tpu.vector_store %arg8[%104, %c128_39], %103 {strides = array<i32>} : memref<8x192xf32, #tpu.memory_space<vmem>>, vector<1x64xf32>,
    %c5_i32 = arith.constant 5 : i32
    %106 = arith.addi %0, %c5_i32 : i32
    %107 = arith.index_cast %106 : i32 to index
    %c0_40 = arith.constant 0 : index
    %108 = memref.load %arg1[%107, %c0_40] : memref<16x3xi32, #tpu.memory_space<smem>>
    %109 = arith.index_cast %108 : i32 to index
    %c0_41 = arith.constant 0 : index
    %110 = vector.load %arg2[%109, %c0_41] : memref<256x64xf32, #tpu.memory_space<vmem>>, vector<1x64xf32>
    %111 = arith.index_cast %c5_i32 : i32 to index
    %c0_42 = arith.constant 0 : index
    %112 = vector.load %arg8[%111, %c0_42] : memref<8x192xf32, #tpu.memory_space<vmem>>, vector<1x64xf32>
    tpu.vector_store %arg8[%111, %c0_42], %110 {strides = array<i32>} : memref<8x192xf32, #tpu.memory_space<vmem>>, vector<1x64xf32>,
    %113 = arith.addi %0, %c5_i32 : i32
    %114 = arith.index_cast %113 : i32 to index
    %c1_43 = arith.constant 1 : index
    %115 = memref.load %arg1[%114, %c1_43] : memref<16x3xi32, #tpu.memory_space<smem>>
    %116 = arith.index_cast %115 : i32 to index
    %c0_44 = arith.constant 0 : index
    %117 = vector.load %arg2[%116, %c0_44] : memref<256x64xf32, #tpu.memory_space<vmem>>, vector<1x64xf32>
    %118 = arith.index_cast %c5_i32 : i32 to index
    %c64_45 = arith.constant 64 : index
    %119 = vector.load %arg8[%118, %c64_45] : memref<8x192xf32, #tpu.memory_space<vmem>>, vector<1x64xf32>
    tpu.vector_store %arg8[%118, %c64_45], %117 {strides = array<i32>} : memref<8x192xf32, #tpu.memory_space<vmem>>, vector<1x64xf32>,
    %120 = arith.addi %0, %c5_i32 : i32
    %121 = arith.index_cast %120 : i32 to index
    %c2_46 = arith.constant 2 : index
    %122 = memref.load %arg1[%121, %c2_46] : memref<16x3xi32, #tpu.memory_space<smem>>
    %123 = arith.index_cast %122 : i32 to index
    %c0_47 = arith.constant 0 : index
    %124 = vector.load %arg2[%123, %c0_47] : memref<256x64xf32, #tpu.memory_space<vmem>>, vector<1x64xf32>
    %125 = arith.index_cast %c5_i32 : i32 to index
    %c128_48 = arith.constant 128 : index
    %126 = vector.load %arg8[%125, %c128_48] : memref<8x192xf32, #tpu.memory_space<vmem>>, vector<1x64xf32>
    tpu.vector_store %arg8[%125, %c128_48], %124 {strides = array<i32>} : memref<8x192xf32, #tpu.memory_space<vmem>>, vector<1x64xf32>,
    %c6_i32 = arith.constant 6 : i32
    %127 = arith.addi %0, %c6_i32 : i32
    %128 = arith.index_cast %127 : i32 to index
    %c0_49 = arith.constant 0 : index
    %129 = memref.load %arg1[%128, %c0_49] : memref<16x3xi32, #tpu.memory_space<smem>>
    %130 = arith.index_cast %129 : i32 to index
    %c0_50 = arith.constant 0 : index
    %131 = vector.load %arg2[%130, %c0_50] : memref<256x64xf32, #tpu.memory_space<vmem>>, vector<1x64xf32>
    %132 = arith.index_cast %c6_i32 : i32 to index
    %c0_51 = arith.constant 0 : index
    %133 = vector.load %arg8[%132, %c0_51] : memref<8x192xf32, #tpu.memory_space<vmem>>, vector<1x64xf32>
    tpu.vector_store %arg8[%132, %c0_51], %131 {strides = array<i32>} : memref<8x192xf32, #tpu.memory_space<vmem>>, vector<1x64xf32>,
    %134 = arith.addi %0, %c6_i32 : i32
    %135 = arith.index_cast %134 : i32 to index
    %c1_52 = arith.constant 1 : index
    %136 = memref.load %arg1[%135, %c1_52] : memref<16x3xi32, #tpu.memory_space<smem>>
    %137 = arith.index_cast %136 : i32 to index
    %c0_53 = arith.constant 0 : index
    %138 = vector.load %arg2[%137, %c0_53] : memref<256x64xf32, #tpu.memory_space<vmem>>, vector<1x64xf32>
    %139 = arith.index_cast %c6_i32 : i32 to index
    %c64_54 = arith.constant 64 : index
    %140 = vector.load %arg8[%139, %c64_54] : memref<8x192xf32, #tpu.memory_space<vmem>>, vector<1x64xf32>
    tpu.vector_store %arg8[%139, %c64_54], %138 {strides = array<i32>} : memref<8x192xf32, #tpu.memory_space<vmem>>, vector<1x64xf32>,
    %141 = arith.addi %0, %c6_i32 : i32
    %142 = arith.index_cast %141 : i32 to index
    %c2_55 = arith.constant 2 : index
    %143 = memref.load %arg1[%142, %c2_55] : memref<16x3xi32, #tpu.memory_space<smem>>
    %144 = arith.index_cast %143 : i32 to index
    %c0_56 = arith.constant 0 : index
    %145 = vector.load %arg2[%144, %c0_56] : memref<256x64xf32, #tpu.memory_space<vmem>>, vector<1x64xf32>
    %146 = arith.index_cast %c6_i32 : i32 to index
    %c128_57 = arith.constant 128 : index
    %147 = vector.load %arg8[%146, %c128_57] : memref<8x192xf32, #tpu.memory_space<vmem>>, vector<1x64xf32>
    tpu.vector_store %arg8[%146, %c128_57], %145 {strides = array<i32>} : memref<8x192xf32, #tpu.memory_space<vmem>>, vector<1x64xf32>,
    %c7_i32 = arith.constant 7 : i32
    %148 = arith.addi %0, %c7_i32 : i32
    %149 = arith.index_cast %148 : i32 to index
    %c0_58 = arith.constant 0 : index
    %150 = memref.load %arg1[%149, %c0_58] : memref<16x3xi32, #tpu.memory_space<smem>>
    %151 = arith.index_cast %150 : i32 to index
    %c0_59 = arith.constant 0 : index
    %152 = vector.load %arg2[%151, %c0_59] : memref<256x64xf32, #tpu.memory_space<vmem>>, vector<1x64xf32>
    %153 = arith.index_cast %c7_i32 : i32 to index
    %c0_60 = arith.constant 0 : index
    %154 = vector.load %arg8[%153, %c0_60] : memref<8x192xf32, #tpu.memory_space<vmem>>, vector<1x64xf32>
    tpu.vector_store %arg8[%153, %c0_60], %152 {strides = array<i32>} : memref<8x192xf32, #tpu.memory_space<vmem>>, vector<1x64xf32>,
    %155 = arith.addi %0, %c7_i32 : i32
    %156 = arith.index_cast %155 : i32 to index
    %c1_61 = arith.constant 1 : index
    %157 = memref.load %arg1[%156, %c1_61] : memref<16x3xi32, #tpu.memory_space<smem>>
    %158 = arith.index_cast %157 : i32 to index
    %c0_62 = arith.constant 0 : index
    %159 = vector.load %arg2[%158, %c0_62] : memref<256x64xf32, #tpu.memory_space<vmem>>, vector<1x64xf32>
    %160 = arith.index_cast %c7_i32 : i32 to index
    %c64_63 = arith.constant 64 : index
    %161 = vector.load %arg8[%160, %c64_63] : memref<8x192xf32, #tpu.memory_space<vmem>>, vector<1x64xf32>
    tpu.vector_store %arg8[%160, %c64_63], %159 {strides = array<i32>} : memref<8x192xf32, #tpu.memory_space<vmem>>, vector<1x64xf32>,
    %162 = arith.addi %0, %c7_i32 : i32
    %163 = arith.index_cast %162 : i32 to index
    %c2_64 = arith.constant 2 : index
    %164 = memref.load %arg1[%163, %c2_64] : memref<16x3xi32, #tpu.memory_space<smem>>
    %165 = arith.index_cast %164 : i32 to index
    %c0_65 = arith.constant 0 : index
    %166 = vector.load %arg2[%165, %c0_65] : memref<256x64xf32, #tpu.memory_space<vmem>>, vector<1x64xf32>
    %167 = arith.index_cast %c7_i32 : i32 to index
    %c128_66 = arith.constant 128 : index
    %168 = vector.load %arg8[%167, %c128_66] : memref<8x192xf32, #tpu.memory_space<vmem>>, vector<1x64xf32>
    tpu.vector_store %arg8[%167, %c128_66], %166 {strides = array<i32>} : memref<8x192xf32, #tpu.memory_space<vmem>>, vector<1x64xf32>,
    %c8_i32_67 = arith.constant 8 : i32
    %c0_68 = arith.constant 0 : index
    %c0_69 = arith.constant 0 : index
    %169 = vector.load %arg8[%c0_68, %c0_69] : memref<8x192xf32, #tpu.memory_space<vmem>>, vector<8x192xf32>
    %170 = arith.truncf %169 : vector<8x192xf32> to vector<8x192xbf16>
    %c0_70 = arith.constant 0 : index
    %c0_71 = arith.constant 0 : index
    %171 = vector.load %arg3[%c0_70, %c0_71] : memref<192x128xbf16, #tpu.memory_space<vmem>>, vector<192x128xbf16>
    %cst = arith.constant dense<0.000000e+00> : vector<8x128xf32>
    %172 = tpu.matmul %170, %171, %cst {dimension_numbers = #tpu.dot_dimension_numbers<[1], [0], [0], [1], [0, 0, 1, 1], [], []>} : vector<8x192xbf16>, vector<192x128xbf16>, vector<8x128xf32> -> vector<8x128xf32>
    %c0_72 = arith.constant 0 : index
    %c0_73 = arith.constant 0 : index
    %173 = vector.load %arg4[%c0_72, %c0_73] : memref<1x128xf32, #tpu.memory_space<vmem>>, vector<1x128xf32>
    %174 = vector.broadcast %173 : vector<1x128xf32> to vector<8x128xf32>
    %175 = arith.addf %172, %174 : vector<8x128xf32>
    %176 = math.tanh %175 : vector<8x128xf32>
    %177 = arith.truncf %176 : vector<8x128xf32> to vector<8x128xbf16>
    %c0_74 = arith.constant 0 : index
    %c0_75 = arith.constant 0 : index
    %178 = vector.load %arg5[%c0_74, %c0_75] : memref<128x256xbf16, #tpu.memory_space<vmem>>, vector<128x256xbf16>
    %cst_76 = arith.constant dense<0.000000e+00> : vector<8x256xf32>
    %179 = tpu.matmul %177, %178, %cst_76 {dimension_numbers = #tpu.dot_dimension_numbers<[1], [0], [0], [1], [0, 0, 1, 1], [], []>} : vector<8x128xbf16>, vector<128x256xbf16>, vector<8x256xf32> -> vector<8x256xf32>
    %c0_77 = arith.constant 0 : index
    %c0_78 = arith.constant 0 : index
    %180 = vector.load %arg6[%c0_77, %c0_78] : memref<1x256xf32, #tpu.memory_space<vmem>>, vector<1x256xf32>
    %181 = vector.broadcast %180 : vector<1x256xf32> to vector<8x256xf32>
    %182 = arith.addf %179, %181 : vector<8x256xf32>
    %cst_79 = arith.constant dense<0xFF800000> : vector<8xf32>
    %183 = vector.multi_reduction <maximumf>, %182, %cst_79 [1] : vector<8x256xf32> to vector<8xf32>
    %184 = vector.shape_cast %183 : vector<8xf32> to vector<8x1xf32>
    %185 = vector.broadcast %184 : vector<8x1xf32> to vector<8x256xf32>
    %186 = arith.subf %182, %185 : vector<8x256xf32>
    %187 = math.exp %186 : vector<8x256xf32>
    %cst_80 = arith.constant dense<0.000000e+00> : vector<8xf32>
    %188 = vector.multi_reduction <add>, %187, %cst_80 [1] : vector<8x256xf32> to vector<8xf32>
    %189 = vector.shape_cast %188 : vector<8xf32> to vector<8x1xf32>
    %190 = math.log %189 : vector<8x1xf32>
    %191 = vector.broadcast %190 : vector<8x1xf32> to vector<8x256xf32>
    %192 = arith.subf %186, %191 : vector<8x256xf32>
    %c0_81 = arith.constant 0 : index
    %c0_82 = arith.constant 0 : index
    %193 = vector.load %arg7[%c0_81, %c0_82] : memref<8x256xf32, #tpu.memory_space<vmem>>, vector<8x256xf32>
    tpu.vector_store %arg7[%c0_81, %c0_82], %192 {strides = array<i32>} : memref<8x256xf32, #tpu.memory_space<vmem>>, vector<8x256xf32>,
    return
  }
  func.func @transform_0(%arg0: i32, %arg1: memref<16x3xi32, #tpu.memory_space<smem>>) -> (i32, i32) {
    %c0_i32 = arith.constant 0 : i32
    %c0_i32_0 = arith.constant 0 : i32
    %c0_i32_1 = arith.constant 0 : i32
    return %c0_i32, %c0_i32_0 : i32, i32
  }
  func.func @transform_1(%arg0: i32, %arg1: memref<16x3xi32, #tpu.memory_space<smem>>) -> (i32, i32) {
    %c0_i32 = arith.constant 0 : i32
    %c0_i32_0 = arith.constant 0 : i32
    %c0_i32_1 = arith.constant 0 : i32
    return %c0_i32, %c0_i32_0 : i32, i32
  }
  func.func @transform_2(%arg0: i32, %arg1: memref<16x3xi32, #tpu.memory_space<smem>>) -> (i32, i32) {
    %c0_i32 = arith.constant 0 : i32
    %c0_i32_0 = arith.constant 0 : i32
    %c0_i32_1 = arith.constant 0 : i32
    return %c0_i32, %c0_i32_0 : i32, i32
  }
  func.func @transform_3(%arg0: i32, %arg1: memref<16x3xi32, #tpu.memory_space<smem>>) -> (i32, i32) {
    %c0_i32 = arith.constant 0 : i32
    %c0_i32_0 = arith.constant 0 : i32
    %c0_i32_1 = arith.constant 0 : i32
    return %c0_i32, %c0_i32_0 : i32, i32
  }
  func.func @transform_4(%arg0: i32, %arg1: memref<16x3xi32, #tpu.memory_space<smem>>) -> (i32, i32) {
    %c0_i32 = arith.constant 0 : i32
    %c0_i32_0 = arith.constant 0 : i32
    %c0_i32_1 = arith.constant 0 : i32
    return %c0_i32, %c0_i32_0 : i32, i32
  }
  func.func @transform_5(%arg0: i32, %arg1: memref<16x3xi32, #tpu.memory_space<smem>>) -> (i32, i32) {
    %c0_i32 = arith.constant 0 : i32
    %c0_i32_0 = arith.constant 0 : i32
    return %arg0, %c0_i32 : i32, i32
  }
}

</mosaic_0001>

<bundles_post_ra>
// kernel: tpu_custom_call.1
= control target key start
LH: loop header
LB: loop body
LE: loop exit
PB: predicated region body
PF: predicated region fallthrough
CT: control target
= control target key end

     0   :  { %s1430_s0 = inlined_call_operand.vmem [shape: s32[16,3], index: 0, kind: input, shape index: {}]   ;;  %s1431_s1 = inlined_call_operand.vmem [shape: f32[256,64], index: 1, kind: input, shape index: {}]   ;;  %s1432_s2 = inlined_call_operand.vmem [shape: bf16[192,128], index: 2, kind: input, shape index: {}]   ;;  %s1433_s3 = inlined_call_operand.vmem [shape: f32[1,128], index: 3, kind: input, shape index: {}]   ;;  %s1434_s4 = inlined_call_operand.vmem [shape: bf16[128,256], index: 4, kind: input, shape index: {}]   ;;  %s1435_s5 = inlined_call_operand.vmem [shape: f32[1,256], index: 5, kind: input, shape index: {}]   ;;  %s1436_s6 = inlined_call_operand.hbm [shape: f32[16,256], index: 6, kind: output, shape index: {}]  }
   0x1   :  { %1446 = sst [smem:[#allocation16_spill]] %s1436_s6  ;;  %s11_s23 = sshll.u32 %s1430_s0, 4  ;;  %s12_s23 = int_to_ptr.vmem [resolvable:$true] %s11_s23 }
   0x2   :  { %s936_s24 = scalar_lea.vmem %s12_s23, 256  ;;  %p941_p1 = scmp.lt.s32.totalorder %s12_s23, %s12_s23 }
   0x3   :  { %p937_p0 = scmp.ne.s32.totalorder %s12_s23, %s936_s24  ;;  %p942_p2 = scmp.lt.s32.totalorder %s936_s24, %s936_s24 }
   0x5   :  { %p943_p3 = por %p942_p2, %p941_p1 }
   0x7   :  { %p944_p4 = pnand %p943_p3, %p937_p0 }
   0x9   :  { %947 = shalt.err (!%p944_p4)  }
   0xa   :  { %s1014_s25 = smov [#allocation4]  }
   0xb   :  { %14 = dma.vmem_to_smem %s12_s23, 256, %s1014_s25, [#allocation3] }
   0xc   :  { %992 = dma.done.wait [#allocation3], 256 }
   0xd   :  { %993 = vsyncadd [#allocation3], 4294967040 }
   0xe   :  { %16 = sfence }
   0xf   :  { %17 = vsyncpa [#allocation6], 0 }
  0x10   :  { %19 = vsyncpa [#allocation6 + $0x1], 0  ;;  %s1056_s26 = smov 0   ;;  %s1058_s27 = smov 0  }
  0x11   :  { %s1060_s0 = smov 0   ;;  %s1062_s28 = smov 0  }
  0x12 LB: > { %1447 = sst [smem:[#allocation9_spill]] %s1000_s26  ;;  %s1077_s29 = sadd.s32 4294967295, %s1012_s28   ;;  %s1012_s28 = sphi %s1062_s28, %s1461_s28   ;;  %s1008_s0 = sphi %s1060_s0, %s1463_s0   ;;  %s1004_s27 = sphi %s1058_s27, %s1465_s27   ;;  %s1000_s26 = sphi %s1056_s26, %s1464_s26  }
  0x13   : > { %1448 = sst [smem:[#allocation10_spill]] %s1008_s0  ;;  %s779_s30 = sadd.s32 4294967294, %s1012_s28  }
  0x14   : > { %1449 = sst [smem:[#allocation11_spill]] %s1012_s28  ;;  %s1081_s7 = sadd.s32 1, %s1012_s28  }
  0x15   : > { %1450 = sst [smem:[#allocation12_spill]] %s1081_s7  ;;  %s137_s8 = sadd.s32 1, %s1008_s0 }
  0x16   : > { %s134_s9 = ssub.s32 %s1012_s28, %s1081_s7  ;;  %p147_p5 = scmp.ne.s32.totalorder %s1008_s0, %s1004_s27 }
  0x17   : > { %p135_p6 = scmp.eq.s32.totalorder %s134_s9, 0  ;;  %p148_p7 = scmp.eq.s32.totalorder %s1077_s29, 1 }
  0x18   : > { %p153_p8 = scmp.ne.s32.totalorder %s1004_s27, %s1000_s26  ;;  %p154_p9 = scmp.eq.s32.totalorder %s779_s30, 1 }
  0x19   : > { %s1092_s10 = scalar_select %p135_p6, %s1008_s0, %s137_s8  }
  0x1a   : > { %p1094_p10 = por %p148_p7, %p147_p5  ;;  %p1098_p11 = por %p154_p9, %p153_p8 }
  0x1b   : > { %1451 = sst [smem:[#allocation13_spill]] %s1092_s10  ;;  %p781_p12 = scmp.ge.s32.totalorder %s1012_s28, 1 }
  0x1c   : > { %s1452_s11 = scalar_select %p1094_p10, 1, 0 }
  0x1d   : > { %s1454_s12 = scalar_select %p1098_p11, 1, 0 }
  0x1e   : > { %1453 = sst [smem:[#allocation14_spill]] %s1452_s11  ;;  %p187_p13 = scmp.lt.s32.totalorder %s1012_s28, 3 }
  0x1f   : > { %1455 = sst [smem:[#allocation15_spill]] %s1454_s12 }
  0x20   : > { %p188_p0 = pnand %p781_p12, %p187_p13 }
  0x21   : > { %s1105_s13 = sshll.u32 (!%p188_p0), %s1077_s29, 10  ;;  %v1015_v0 = vmov (!%p188_p0), 0   ;;  %v892_v1 = vld [vmem:[%s1432_s2] sm:$0xff] (!%p188_p0)   ;;  %v893_v2 = vld [vmem:[%s1432_s2 + $0x8] sm:$0xff] (!%p188_p0)   ;;  %v894_v3 = vld [vmem:[%s1432_s2 + $0x10] sm:$0xff] (!%p188_p0)   ;;  %vm216_vm0 = vcmask (!%p188_p0), 516096  }
  0x22   : > { %191 = sbr.rel (%p188_p0) target bundleno = 965 (0x3c5), region = 40  ;;  %s1108_s14 = sadd.s32 (!%p188_p0), 256, %s1105_s13  ;;  %484 = vmatprep.subr.bf16.mxu0 (!%p188_p0), %v1015_v0  ;;  %666 = vmatprep.mubr.bf16.mxu1 (!%p188_p0), %v1015_v0  ;;  %v895_v6 = vld [vmem:[%s1432_s2 + $0x18] sm:$0xff] (!%p188_p0)   ;;  %v896_v10 = vld [vmem:[%s1432_s2 + $0x20] sm:$0xff] (!%p188_p0)   ;;  %v897_v13 = vld [vmem:[%s1432_s2 + $0x28] sm:$0xff] (!%p188_p0)   ;;  %vm480_vm1 = vcmask (!%p188_p0), 523264  }
  0x23   : > { %s218_s15 = sadd.s32 (!%p188_p0), 1, %s1105_s13  ;;  %s259_s20 = sadd.s32 (!%p188_p0), 1, %s1108_s14  ;;  %485 = vmatpush1.bf16.msra.mxu0 (!%p188_p0), %v892_v1  ;;  %v898_v16 = vld [vmem:[%s1432_s2 + $0x30] sm:$0xff] (!%p188_p0)   ;;  %v899_v20 = vld [vmem:[%s1432_s2 + $0x38] sm:$0xff] (!%p188_p0)   ;;  %v904_v21 = vld [vmem:[%s1434_s4 + $0x4] ss:$8 sps:$4 sm:$0xff] (!%p188_p0)  }
  0x24   : > { %s268_s21 = sadd.s32 (!%p188_p0), 2, %s1108_s14  ;;  %s260_s22 = sld [smem:[#allocation4 + %s259_s20]] (!%p188_p0)  ;;  %486 = vmatprep.subr.bf16.mxu0 (!%p188_p0), %v1015_v0  ;;  %v906_v22 = vld [vmem:[%s1434_s4] ss:$8 sps:$4 sm:$0xff] (!%p188_p0)   ;;  %v907_v24 = vld [vmem:[%s1434_s4 + $0x14] ss:$8 sps:$4 sm:$0xff] (!%p188_p0)   ;;  %634 = vmatprep.subr.bf16.mxu1 (!%p188_p0), %v904_v21 }
  0x25   : > { %s269_s23 = sld [smem:[#allocation4 + %s268_s21]] (!%p188_p0)  ;;  %s1122_s25 = sadd.s32 (!%p188_p0), 384, %s1105_s13  ;;  %v900_v27 = vld [vmem:[%s1432_s2 + $0x40] sm:$0xff] (!%p188_p0)   ;;  %v909_v28 = vld [vmem:[%s1434_s4 + $0x10] ss:$8 sps:$4 sm:$0xff] (!%p188_p0)   ;;  %635 = vmatpush1.bf16.msra.mxu1 (!%p188_p0), %v906_v22  ;;  %v901_v36 = vld [vmem:[%s1432_s2 + $0x48] sm:$0xff] (!%p188_p0)  }
  0x26   : > { %s219_s24 = sld [smem:[#allocation4 + %s218_s15]] (!%p188_p0)  ;;  %s279_s30 = sadd.s32 (!%p188_p0), 1, %s1122_s25  ;;  %636 = vmatprep.subr.bf16.mxu1 (!%p188_p0), %v907_v24  ;;  %v910_v32 = vld [vmem:[%s1434_s4 + $0x24] ss:$8 sps:$4 sm:$0xff] (!%p188_p0)   ;;  %v912_v38 = vld [vmem:[%s1434_s4 + $0x20] ss:$8 sps:$4 sm:$0xff] (!%p188_p0)  }
  0x27   : > { %s288_s8 = sadd.s32 (!%p188_p0), 2, %s1122_s25  ;;  %s280_s9 = sld [smem:[#allocation4 + %s279_s30]] (!%p188_p0)  ;;  %487 = vmatpush1.bf16.msra.mxu0 (!%p188_p0), %v893_v2  ;;  %v913_v40 = vld [vmem:[%s1434_s4 + $0x34] ss:$8 sps:$4 sm:$0xff] (!%p188_p0)   ;;  %v915_v42 = vld [vmem:[%s1434_s4 + $0x30] ss:$8 sps:$4 sm:$0xff] (!%p188_p0)  }
  0x28   : > { %s289_s16 = sld [smem:[#allocation4 + %s288_s8]] (!%p188_p0)  ;;  %s1131_s19 = sadd.s32 (!%p188_p0), 128, %s1105_s13  ;;  %488 = vmatprep.subr.bf16.mxu0 (!%p188_p0), %v1015_v0  ;;  %v902_v41 = vld [vmem:[%s1432_s2 + $0x50] sm:$0xff] (!%p188_p0)   ;;  %v903_v44 = vld [vmem:[%s1432_s2 + $0x58] sm:$0xff] (!%p188_p0)   ;;  %vm226_vm2 = vcmask (!%p188_p0), 1040896  }
  0x29   : > { %s1134_s20 = sadd.s32 640, %s1105_s13  ;;  %s239_s15 = sadd.s32 1, %s1131_s19  ;;  %637 = vmatpush1.bf16.msra.mxu1 %v909_v28  ;;  %v916_v57 = vld [vmem:[%s1434_s4 + $0x44] ss:$8 sps:$4 sm:$0xff]   ;;  %v918_v58 = vld [vmem:[%s1434_s4 + $0x40] ss:$8 sps:$4 sm:$0xff]  }
  0x2a   : > { %s248_s21 = sadd.s32 2, %s1131_s19  ;;  %s261_s8 = scalar_lea.vmem %s1431_s1, %s260_s22  ;;  %638 = vmatprep.subr.bf16.mxu1 %v910_v32  ;;  %v919_v59 = vld [vmem:[%s1434_s4 + $0x54] ss:$8 sps:$4 sm:$0xff]   ;;  %v921_v60 = vld [vmem:[%s1434_s4 + $0x50] ss:$8 sps:$4 sm:$0xff]  }
  0x2b   : > { %s270_s18 = scalar_lea.vmem %s1431_s1, %s269_s23  ;;  %v262_v4 = vld [vmem:[%s261_s8] sm:$0x1]  ;;  %s240_s28 = sld [smem:[#allocation4 + %s239_s15]]  ;;  %489 = vmatpush1.bf16.msra.mxu0 %v894_v3  ;;  %v922_v61 = vld [vmem:[%s1434_s4 + $0x64] ss:$8 sps:$4 sm:$0xff]  }
  0x2c   : > { %v271_v5 = vld [vmem:[%s270_s18] sm:$0x1]  ;;  %s220_s26 = scalar_lea.vmem %s1431_s1, %s219_s24  ;;  %s1016_s10 = smov 64   ;;  %490 = vmatprep.subr.bf16.mxu0 %v1015_v0  ;;  %v925_v63 = vld [vmem:[%s1434_s4 + $0x74] ss:$8 sps:$4 sm:$0xff]  }
  0x2d   : > { %272 = vst.msk [vmem:[#allocation2 + $0xa] sm:$0x1] %vm216_vm0, %v271_v5  ;;  %264 = vrot.lane.b32.xlu1 %v262_v4, %s1016_s10  ;;  %v221_v7 = vld [vmem:[%s220_s26] sm:$0x1]  ;;  %s249_s0 = sld [smem:[#allocation4 + %s248_s21]]  ;;  %s319_s22 = sadd.s32 1, %s1134_s20  ;;  %639 = vmatpush1.bf16.msra.mxu1 %v912_v38 }
  0x2e   : > { %223 = vrot.lane.b32.xlu0 %v221_v7, %s1016_s10  ;;  %s281_s23 = scalar_lea.vmem %s1431_s1, %s280_s9  ;;  %s290_s11 = scalar_lea.vmem %s1431_s1, %s289_s16  ;;  %640 = vmatprep.subr.bf16.mxu1 %v913_v40  ;;  %v924_v62 = vld [vmem:[%s1434_s4 + $0x60] ss:$8 sps:$4 sm:$0xff]  }
  0x2f   : > { %v282_v8 = vld [vmem:[%s281_s23] sm:$0x1]  ;;  %s320_s15 = sld [smem:[#allocation4 + %s319_s22]]  ;;  %s328_s30 = sadd.s32 2, %s1134_s20  ;;  %491 = vmatpush1.bf16.msra.mxu0 %v895_v6 }
  0x30   : > { %v291_v9 = vld [vmem:[%s290_s11] sm:$0x1]  ;;  %s329_s26 = sld [smem:[#allocation4 + %s328_s30]]  ;;  %s1165_s21 = sadd.s32 512, %s1105_s13  ;;  %492 = vmatprep.subr.bf16.mxu0 %v1015_v0 }
  0x31   : > { %292 = vst.msk [vmem:[#allocation2 + $0xb] sm:$0x1] %vm216_vm0, %v291_v9  ;;  %284 = vrot.lane.b32.xlu1 %v282_v8, %s1016_s10  ;;  %s299_s9 = sadd.s32 1, %s1165_s21  ;;  %s308_s16 = sadd.s32 2, %s1165_s21  ;;  %641 = vmatpush1.bf16.msra.mxu1 %v915_v42  ;;  %v792_v1 = vld [vmem:[%s1433_s3] ss:$0 sm:$0xff]  ;;  %v544_v9 = vlaneseq }
  0x32   : > { %s241_s7 = scalar_lea.vmem %s1431_s1, %s240_s28  ;;  %s300_s12 = sld [smem:[#allocation4 + %s299_s9]]  ;;  %642 = vmatprep.subr.bf16.mxu1 %v916_v57 }
  0x33   : > { %v242_v11 = vld [vmem:[%s241_s7] sm:$0x1]  ;;  %s250_s6 = scalar_lea.vmem %s1431_s1, %s249_s0  ;;  %s309_s11 = sld [smem:[#allocation4 + %s308_s16]]  ;;  %493 = vmatpush1.bf16.msra.mxu0 %v896_v10  ;;  %v545_v10 = vshrl.u32 %v544_v9, 7 }
  0x34   : > { %v251_v12 = vld [vmem:[%s250_s6] sm:$0x1]  ;;  %244 = vrot.lane.b32.xlu0 %v242_v11, %s1016_s10  ;;  %s1182_s30 = sadd.s32 896, %s1105_s13  ;;  %s1185_s8 = sadd.s32 768, %s1105_s13  ;;  %494 = vmatprep.subr.bf16.mxu0 %v1015_v0 }
  0x35   : > { %252 = vst.msk [vmem:[#allocation2 + $0x9] sm:$0x1] %vm216_vm0, %v251_v12  ;;  %s321_s0 = scalar_lea.vmem %s1431_s1, %s320_s15  ;;  %s359_s16 = sadd.s32 1, %s1182_s30  ;;  %643 = vmatpush1.bf16.msra.mxu1 %v918_v58  ;;  %v546_v11 = vsub.s32 0, %v545_v10  ;;  %v542_v12 = vld [vmem:[%s1435_s5] sm:$0x3] }
  0x36   : > { %v322_v14 = vld [vmem:[%s321_s0] sm:$0x1]  ;;  %s330_s23 = scalar_lea.vmem %s1431_s1, %s329_s26  ;;  %s360_s24 = sld [smem:[#allocation4 + %s359_s16]]  ;;  %644 = vmatprep.subr.bf16.mxu1 %v919_v59 }
  0x37   : > { %v331_v15 = vld [vmem:[%s330_s23] sm:$0x1]  ;;  %324 = vrot.lane.b32.xlu1 %v322_v14, %s1016_s10  ;;  %s368_s6 = sadd.s32 2, %s1182_s30  ;;  %s339_s17 = sadd.s32 1, %s1185_s8  ;;  %495 = vmatpush1.bf16.msra.mxu0 %v897_v13  ;;  %v550_v13 = vsub.s32 1, %v545_v10  ;;  %v547_v14 = vrot.slane %v542_v12, %v546_v11 }
  0x38   : > { %332 = vst.msk [vmem:[#allocation2 + $0xd] sm:$0x1] %vm216_vm0, %v331_v15  ;;  %s301_s26 = scalar_lea.vmem %s1431_s1, %s300_s12  ;;  %s369_s0 = sld [smem:[#allocation4 + %s368_s6]]  ;;  %496 = vmatprep.subr.bf16.mxu0 %v1015_v0 }
  0x39   : > { %v302_v17 = vld [vmem:[%s301_s26] sm:$0x1]  ;;  %s310_s7 = scalar_lea.vmem %s1431_s1, %s309_s11  ;;  %s340_s23 = sld [smem:[#allocation4 + %s339_s17]]  ;;  %645 = vmatpush1.bf16.msra.mxu1 %v921_v60  ;;  %v551_v15 = vrot.slane %v542_v12, %v550_v13 }
  0x3a   : > { %v311_v18 = vld [vmem:[%s310_s7] sm:$0x1]  ;;  %304 = vrot.lane.b32.xlu0 %v302_v17, %s1016_s10  ;;  %s348_s28 = sadd.s32 2, %s1185_s8  ;;  %s255_s9 = sld [smem:[#allocation4 + %s1108_s14]]  ;;  %646 = vmatprep.subr.bf16.mxu1 %v922_v61 }
  0x3b   : > { %312 = vst.msk [vmem:[#allocation2 + $0xc] sm:$0x1] %vm216_vm0, %v311_v18  ;;  %s1217_s12 = sld [smem:[#allocation4 + %s348_s28]]  ;;  %497 = vmatpush1.bf16.msra.mxu0 %v898_v16 }
  0x3c   : > { %s1220_s6 = sld [smem:[#allocation4 + %s1105_s13]]  ;;  %s361_s17 = scalar_lea.vmem %s1431_s1, %s360_s24  ;;  %498 = vmatprep.subr.bf16.mxu0 %v1015_v0 }
  0x3d   : > { %s1226_s18 = sld [smem:[#allocation4 + %s1122_s25]]  ;;  %v362_v19 = vld [vmem:[%s361_s17] sm:$0x1]  ;;  %647 = vmatpush1.bf16.msra.mxu1 %v924_v62 }
  0x3e   : > { %s1232_s14 = sld [smem:[#allocation4 + %s1131_s19]]  ;;  %s370_s15 = scalar_lea.vmem %s1431_s1, %s369_s0  ;;  %364 = vrot.lane.b32.xlu1 %v362_v19, %s1016_s10  ;;  %648 = vmatprep.subr.bf16.mxu1 %v925_v63 }
  0x3f   : > { %s1235_s22 = sld [smem:[#allocation4 + %s1134_s20]]  ;;  %v371_v23 = vld [vmem:[%s370_s15] sm:$0x1]  ;;  %s341_s0 = scalar_lea.vmem %s1431_s1, %s340_s23  ;;  %499 = vmatpush1.bf16.msra.mxu0 %v899_v20 }
  0x40   : > { %s1243_s25 = sld [smem:[#allocation4 + %s1165_s21]]  ;;  %372 = vst.msk [vmem:[#allocation2 + $0xf] sm:$0x1] %vm216_vm0, %v371_v23  ;;  %v342_v25 = vld [vmem:[%s341_s0] sm:$0x1]  ;;  %s256_s11 = scalar_lea.vmem %s1431_s1, %s255_s9  ;;  %500 = vmatprep.subr.bf16.mxu0 %v1015_v0 }
  0x41   : > { %s1255_s16 = sld [smem:[#allocation4 + %s1182_s30]]  ;;  %s350_s30 = scalar_lea.vmem %s1431_s1, %s1217_s12  ;;  %344 = vrot.lane.b32.xlu0 %v342_v25, %s1016_s10  ;;  %v257_v26 = vld [vmem:[%s256_s11] sm:$0x1] }
  0x42   : > { %s1265_s15 = sld [smem:[#allocation4 + %s1185_s8]]  ;;  %s214_s26 = scalar_lea.vmem %s1431_s1, %s1220_s6  ;;  %v351_v29 = vld [vmem:[%s350_s30] sm:$0x1]  ;;  %258 = vst.msk [vmem:[#allocation2 + $0x2] sm:$0x1] %vm216_vm0, %v257_v26 }
  0x43   : > { %v215_v30 = vld [vmem:[%s214_s26] sm:$0x1]  ;;  %s276_s28 = scalar_lea.vmem %s1431_s1, %s1226_s18  ;;  %s228_s6 = sadd.s32 2, %s1105_s13  ;;  %352 = vst.msk [vmem:[#allocation2 + $0xe] sm:$0x1] %vm216_vm0, %v351_v29  ;;  %501 = vmatpush1.bf16.msra.mxu0 %v900_v27 }
  0x44   : > { %217 = vst.msk [vmem:[#allocation2] sm:$0x1] %vm216_vm0, %v215_v30  ;;  %v277_v31 = vld [vmem:[%s276_s28] sm:$0x1]  ;;  %s236_s11 = scalar_lea.vmem %s1431_s1, %s1232_s14  ;;  %s229_s0 = sld [smem:[#allocation4 + %s228_s6]]  ;;  %502 = vmatprep.subr.bf16.mxu0 %v1015_v0 }
  0x45   : > { %s316_s30 = scalar_lea.vmem %s1431_s1, %s1235_s22  ;;  %278 = vst.msk [vmem:[#allocation2 + $0x3] sm:$0x1] %vm216_vm0, %v277_v31  ;;  %v237_v33 = vld [vmem:[%s236_s11] sm:$0x1]  ;;  %s842_s13 = sshll.u32 %s1077_s29, 8 }
  0x46   : > { %v317_v34 = vld [vmem:[%s316_s30] sm:$0x1]  ;;  %s296_s26 = scalar_lea.vmem %s1431_s1, %s1243_s25  ;;  %238 = vst.msk [vmem:[#allocation2 + $0x1] sm:$0x1] %vm216_vm0, %v237_v33  ;;  %s207_s30 = sand.u32 1, %s1004_s27  }
  0x47   : > { %318 = vst.msk [vmem:[#allocation2 + $0x5] sm:$0x1] %vm216_vm0, %v317_v34  ;;  %v297_v35 = vld [vmem:[%s296_s26] sm:$0x1]  ;;  %s356_s9 = scalar_lea.vmem %s1431_s1, %s1255_s16  ;;  %503 = vmatpush1.bf16.msra.mxu0 %v901_v36  ;;  %s782_s17 = sshll.u32 %s207_s30, 4 }
  0x48   : > { %298 = vst.msk [vmem:[#allocation2 + $0x4] sm:$0x1] %vm216_vm0, %v297_v35  ;;  %v357_v37 = vld [vmem:[%s356_s9] sm:$0x1]  ;;  %s336_s12 = scalar_lea.vmem %s1431_s1, %s1265_s15  ;;  %504 = vmatprep.subr.bf16.mxu0 %v1015_v0  ;;  %s209_s20 = scalar_lea.vmem [#allocation5], %s782_s17 }
  0x49   : > { %358 = vst.msk [vmem:[#allocation2 + $0x7] sm:$0x1] %vm216_vm0, %v357_v37  ;;  %v337_v39 = vld [vmem:[%s336_s12] sm:$0x1]  ;;  %s708_s26 = sshll.u32 %s209_s20, 4  ;;  %s1457_s22 = sld [smem:[#allocation16_spill]]  ;;  %s1390_s26 = int_to_ptr.vmem [resolvable:$true] %s708_s26 }
  0x4a   : > { %338 = vst.msk [vmem:[#allocation2 + $0x6] sm:$0x1] %vm216_vm0, %v337_v39  ;;  %s230_s23 = scalar_lea.vmem %s1431_s1, %s229_s0  ;;  %s694_s8 = scalar_lea.sflag [#allocation6], %s207_s30 }
  0x4b   : > { %v231_v43 = vld [vmem:[%s230_s23] sm:$0x1]  ;;  %505 = vmatpush1.bf16.msra.mxu0 %v902_v41  ;;  %s948_s9 = scalar_lea.vmem %s1390_s26, 256  ;;  %s1017_s29 = smov [#allocation5]  }
  0x4c   : > { %232 = vst.msk [vmem:[#allocation2 + $0x8] sm:$0x1] %vm216_vm0, %v231_v43  ;;  %506 = vmatprep.subr.bf16.mxu0 %v1015_v0  ;;  %v927_v0 = vld [vmem:[%s1434_s4 + $0x70] ss:$8 sps:$4 sm:$0xff]   ;;  %p949_p1 = scmp.ne.s32.totalorder %s1390_s26, %s948_s9  ;;  %s952_s25 = sshll.u32 %s1017_s29, 4  ;;  %s953_s25 = int_to_ptr.vmem [resolvable:$false] %s952_s25 }
  0x4d   : > { %649 = vmatpush1.bf16.msra.mxu1 %v927_v0  ;;  %s954_s10 = scalar_lea.vmem %s953_s25, 512  ;;  %p955_p4 = scmp.lt.s32.totalorder %s1390_s26, %s953_s25 }
  0x4e   : > { %p950_p2 = pnand %p949_p1, %p1094_p10  ;;  %p956_p5 = scmp.lt.s32.totalorder %s954_s10, %s948_s9 }
  0x4f   : > { %507 = vmatpush1.bf16.msra.mxu0 %v903_v44  ;;  %s1388_s7 = scalar_lea.hbm %s1457_s22, %s842_s13 }
  0x50   : > { %p951_p3 = pneg %p950_p2  ;;  %p957_p6 = por %p956_p5, %p955_p4 }
  0x52   : > { %p958_p7 = pnand %p957_p6, %p951_p3 }
  0x53   : > { %v374_v45 = vld [vmem:[#allocation2 + $0x8] sm:$0xff] }
  0x54   : > { %v376_v46 = vpack.c.bf16 %v374_v45, %v374_v45 }
  0x56   : > { %805 = vmatprep.mubr.msk.bf16.mxu0 %vm480_vm1, %v376_v46 }
  0x9f   : > { %v265_v47 = vpop.permute.xlu1 %264 }
  0xa0   : > { %267 = vst.msk [vmem:[#allocation2 + $0x2] sm:$0x1] %vm226_vm2, %v265_v47  ;;  %v224_v48 = vpop.permute.xlu0 %223 }
  0xa1   : > { %227 = vst.msk [vmem:[#allocation2] sm:$0x1] %vm226_vm2, %v224_v48 }
  0xa3   : > { %v285_v49 = vpop.permute.xlu1 %284 }
  0xa4   : > { %287 = vst.msk [vmem:[#allocation2 + $0x3] sm:$0x1] %vm226_vm2, %v285_v49 }
  0xa6   : > { %v245_v50 = vpop.permute.xlu0 %244 }
  0xa7   : > { %247 = vst.msk [vmem:[#allocation2 + $0x1] sm:$0x1] %vm226_vm2, %v245_v50 }
  0xa9   : > { %v325_v51 = vpop.permute.xlu1 %324 }
  0xaa   : > { %327 = vst.msk [vmem:[#allocation2 + $0x5] sm:$0x1] %vm226_vm2, %v325_v51 }
  0xac   : > { %v305_v52 = vpop.permute.xlu0 %304 }
  0xad   : > { %307 = vst.msk [vmem:[#allocation2 + $0x4] sm:$0x1] %vm226_vm2, %v305_v52 }
  0xb0   : > { %v365_v53 = vpop.permute.xlu1 %364 }
  0xb1   : > { %367 = vst.msk [vmem:[#allocation2 + $0x7] sm:$0x1] %vm226_vm2, %v365_v53 }
  0xb3   : > { %v345_v54 = vpop.permute.xlu0 %344 }
  0xb4   : > { %347 = vst.msk [vmem:[#allocation2 + $0x6] sm:$0x1] %vm226_vm2, %v345_v54 }
  0xbb   : > { %v373_v55 = vld [vmem:[#allocation2] sm:$0xff] }
  0xbc   : > { %v375_v56 = vpack.c.bf16 %v373_v55, %v373_v55 }
  0xbe   : > { %517 = vmatmul.mubr.bf16.vlgmr.msra.gmra.mrb[0].mxu0 %v375_v56 }
 0x191   : > { %v518_v2 = vpop.f32.mrb[0].mxu0 }
 0x192   : > { %v519_v3 = vadd.f32 %v792_v1, %v518_v2  ;;  %v520_v4 = vpop.f32.mrb[1].mxu0 }
 0x193   : > { %v521_v5 = vpop.f32.mrb[2].mxu0 }
 0x194   : > { %928 = vtanh.f32 %v519_v3  ;;  %v522_v6 = vpop.f32.mrb[3].mxu0 }
 0x19e   : > { %v929_v7 = vpop.eup %928 }
 0x19f   : > { %v525_v8 = vpack.c.bf16 %v929_v7, %v929_v7 }
 0x1a1   : > { %667 = vmatmul.mubr.bf16.vlgmr.msra.gmra.mrb[0].mxu1 %v525_v8 }
 0x274   : > { %v668_v16 = vpop.f32.mrb[0].mxu1 }
 0x275   : > { %v669_v17 = vadd.f32 %v668_v16, %v547_v14  ;;  %v670_v18 = vpop.f32.mrb[1].mxu1 }
 0x276   : > { %v671_v19 = vadd.f32 %v670_v18, %v551_v15  ;;  %v672_v20 = vpop.f32.mrb[2].mxu1 }
 0x277   : > { %v673_v21 = vpop.f32.mrb[3].mxu1 }
 0x278   : > { %v675_v22 = vmax.f32 %v669_v17, %v671_v19 }
 0x27a   : > { %676 = vmax.xlane.f32.xlu0 %v675_v22 }
 0x307   : > { %v677_v23 = vpop.xlane.xlu0 %676 }
 0x308   : > { %v678_v24 = vsub.f32 %v669_v17, %v677_v23  ;;  %v679_v25 = vsub.f32 %v671_v19, %v677_v23 }
 0x30a   : > { %v680_v26 = vmul.f32 1.442695, %v678_v24  ;;  %v682_v27 = vmul.f32 1.442695, %v679_v25 }
 0x30c   : > { %930 = vpow2.f32 %v680_v26 }
 0x30d   : > { %932 = vpow2.f32 %v682_v27 }
 0x316   : > { %v931_v28 = vpop.eup %930 }
 0x317   : > { %v933_v29 = vpop.eup %932 }
 0x318   : > { %v684_v30 = vadd.f32 %v933_v29, %v931_v28 }
 0x31a   : > { %685 = vadd.xlane.f32.xlu1 %v684_v30 }
 0x3a7   : > { %v686_v31 = vpop.xlane.xlu1 %685 }
 0x3a8   : > { %934 = vlog2.f32 %v686_v31 }
 0x3b2   : > { %v935_v32 = vpop.eup %934 }
 0x3b3   : > { %v688_v33 = vmul.f32 0.6931472, %v935_v32 }
 0x3b5   : > { %v689_v34 = vsub.f32 %v678_v24, %v688_v33  ;;  %v690_v35 = vsub.f32 %v679_v25, %v688_v33 }
 0x3b7   : > { %691 = vst [vmem:[%s209_s20] sm:$0xff] %v689_v34  ;;  %692 = vst [vmem:[%s209_s20 + $0x8] sm:$0xff] %v690_v35 }
 0x3b8   : > { %961 = shalt.err (!%p958_p7)
}
 0x3b9   : > { %s962_s12 = scalar_lea.hbm %s1388_s7, 256  ;;  %s966_s21 = scalar_lea.hbm %s1457_s22, 512 }
 0x3ba   : > { %p963_p8 = scmp.ne.s32.totalorder %s1388_s7, %s962_s12  ;;  %p967_p13 = scmp.lt.u32.totalorder %s1388_s7, %s1457_s22 }
 0x3bb   : > { %p968_p0 = scmp.lt.u32.totalorder %s966_s21, %s962_s12  ;;  %p970_p2 = scmp.lt.u32.totalorder %s962_s12, %s1388_s7 }
 0x3bc   : > { %p964_p9 = pnand %p963_p8, %p1094_p10 }
 0x3bd   : > { %p969_p1 = por %p968_p0, %p967_p13 }
 0x3be   : > { %p965_p12 = pneg %p964_p9 }
 0x3bf   : > { %p971_p3 = por %p970_p2, %p969_p1 }
 0x3c1   : > { %p972_p4 = pnand %p971_p3, %p965_p12 }
 0x3c3   : > { %975 = shalt.err (!%p972_p4)
}
 0x3c4   : > { %850 = dma.vmem_to_hbm [thread:$0]  (%p1094_p10), %s1390_s26, 256, %s1388_s7, %s694_s8  }
 0x3c5 PF: > { %s1458_s11 = sld [smem:[#allocation11_spill]]  ;;  %s1459_s15 = sld [smem:[#allocation9_spill]] }
 0x3cb   : > { %p856_p5 = scmp.ge.s32.totalorder %s1458_s11, 2  ;;  %s720_s23 = sand.u32 1, %s1459_s15  }
 0x3cc   : > { %s721_s30 = scalar_lea.sflag [#allocation6], %s720_s23 }
 0x3cd   : > { %p853_p6 = pnand %p856_p5, %p1098_p11 }
 0x3cf   : > { %995 = dma.done.wait (!%p853_p6), %s721_s30, 256  }
 0x3d0   : > { %997 = vsyncadd (!%p853_p6), %s721_s30, 4294967040  ;;  %s1461_s28 = sld [smem:[#allocation12_spill]]  ;;  %s1462_s17 = sld [smem:[#allocation10_spill]] }
 0x3d1   : > { %s1463_s0 = sld [smem:[#allocation13_spill]]  ;;  %s1464_s26 = smov %s1004_s27 }
 0x3d6   : > { %p22_p7 = scmp.ge.s32.totalorder %s1461_s28, 4   ;;  %s1465_s27 = smov %s1462_s17 }
 0x3d8   :  { %24 = sbr.rel (!%p22_p7) target bundleno = 18 (0x12), region = 96 }
 0x3df   :  { %726 = vsyncpa [#allocation6], 1 }
 0x3e0   :  { %728 = vsyncpa [#allocation6 + $0x1], 1 }

</bundles_post_ra>
